<compile_context>
chip_gen: v7x
topology: tpu7x:2x2x1
jax: 0.10.0
libtpu: 0.0.40
codegen_flags: <defaults>
</compile_context>

<pallas_src>
import functools

import jax
import jax.numpy as jnp
from jax.experimental import pallas as pl
from jax.experimental.pallas import tpu as pltpu


# ----------------------------- Pallas kernel -------------------------------------- #

def _maxpool3d_2x2x2_kernel(x_ref, o_ref, *, th, wout, c):
    # x_ref: (2, 2*th, wout, 2*c)  -- D-pair, 2*th input H rows, W-pairs merged on lanes
    # o_ref: (1, th, wout, c)
    x = x_ref[...]
    m = jnp.maximum(x[0], x[1])                      # reduce D pair   -> (2*th, wout, 2c)
    m = m.reshape(th, 2, wout, 2 * c)                # split major dim (layout preserving)
    m = jnp.maximum(m[:, 0], m[:, 1])                # reduce H pair   -> (th, wout, 2c)
    m = jnp.maximum(m[..., :c], m[..., c:])          # reduce W pair (lane halves) -> (th, wout, c)
    o_ref[...] = m[None]


def _pick_h_tile(hout, wout, c, itemsize, budget_bytes=1 << 20):
    # Largest divisor of hout whose *input* block fits the byte budget, so VMEM usage
    # stays bounded (double-buffered) regardless of input volume (v7x: 64 MiB physical).
    best = 1
    for th in range(1, hout + 1):
        if hout % th:
            continue
        blk_bytes = 2 * (2 * th) * wout * (2 * c) * itemsize
        if blk_bytes <= budget_bytes:
            best = th
    return best


def maxpool3d_2x2x2(x_ncdhw):
    """MaxPool3d(kernel_size=2, stride=2) on an NCDHW tensor (floor mode, as in PyTorch)."""
    n, c, d, h, w = x_ncdhw.shape
    do, ho, wo = d // 2, h // 2, w // 2
    assert do > 0 and ho > 0 and wo > 0, "spatial dims must be >= 2"

    # Floor behaviour: drop trailing odd rows/cols/slices (matches PyTorch default).
    x = x_ncdhw[:, :, : 2 * do, : 2 * ho, : 2 * wo]
    # NCDHW -> NDHWC so channels sit on lanes (boundary transpose, plain XLA).
    x = jnp.transpose(x, (0, 2, 3, 4, 1))
    # Merge the innermost W-pair into the lane axis and fold (N, D) into one row axis.
    # Both are contiguous splits/merges -> free reshapes.
    xm = x.reshape(n * 2 * do, 2 * ho, wo, 2 * c)

    th = _pick_h_tile(ho, wo, c, xm.dtype.itemsize)
    grid = (n * do, ho // th)

    out = pl.pallas_call(
        functools.partial(_maxpool3d_2x2x2_kernel, th=th, wout=wo, c=c),
        out_shape=jax.ShapeDtypeStruct((n * do, ho, wo, c), x.dtype),
        grid=grid,
        in_specs=[
            pl.BlockSpec((2, 2 * th, wo, 2 * c), lambda i, hi: (i, hi, 0, 0)),
        ],
        out_specs=pl.BlockSpec((1, th, wo, c), lambda i, hi: (i, hi, 0, 0)),
        compiler_params=pltpu.CompilerParams(
            dimension_semantics=("parallel", "parallel"),
            vmem_limit_bytes=32 * 1024 * 1024,
        ),
    )(xm)

    out = out.reshape(n, do, ho, wo, c)
    return jnp.transpose(out, (0, 4, 1, 2, 3))  # NDHWC -> NCDHW


# UnetBlock_Down.forward(x) == MaxPool3d(kernel_size=2, stride=2)(x)
def unet_block_down_forward(x_ncdhw):
    return maxpool3d_2x2x2(x_ncdhw)


# ----------------------------- main ------------------------------------------------ #

if __name__ == "__main__":
    key = jax.random.PRNGKey(0)
    # NCDHW input consistent with the module: batch=2, channels=4, spatial=16^3.
    x = jax.random.normal(key, (2, 4, 16, 16, 16), jnp.float32)

    fwd = jax.jit(unet_block_down_forward)
    out = jax.block_until_ready(fwd(x))

    # Plain-JAX reference for MaxPool3d(kernel_size=2, stride=2).
    n, c, d, h, w = x.shape
    ref = x.reshape(n, c, d // 2, 2, h // 2, 2, w // 2, 2).max(axis=(3, 5, 7))

    assert out.shape == (2, 4, 8, 8, 8), out.shape
    assert bool(jnp.all(jnp.isfinite(out)))
    assert bool(jnp.allclose(out, ref)), "mismatch vs reference max-pool"
    print("KERNEL_OK")
</pallas_src>

<mosaic_0001>
module attributes {stable_mosaic.version = 11 : i64} {
  func.func @_maxpool3d_2x2x2_kernel(%arg0: i32, %arg1: i32, %arg2: memref<2x16x8x8xf32, #tpu.memory_space<vmem>>, %arg3: memref<1x8x8x4xf32, #tpu.memory_space<vmem>>) attributes {dimension_semantics = [#tpu.dimension_semantics<parallel>, #tpu.dimension_semantics<parallel>], iteration_bounds = array<i64: 16, 1>, scalar_prefetch = 0 : i64, scratch_operands = 0 : i64, tpu.core_type = #tpu.core_type<tc>, window_params = [{transform_indices = @transform_0, window_bounds = array<i64: 2, 16, 8, 8>}, {transform_indices = @transform_1, window_bounds = array<i64: 1, 8, 8, 4>}]} {
    %c0 = arith.constant 0 : index
    %c0_0 = arith.constant 0 : index
    %c0_1 = arith.constant 0 : index
    %c0_2 = arith.constant 0 : index
    %0 = vector.load %arg2[%c0, %c0_0, %c0_1, %c0_2] : memref<2x16x8x8xf32, #tpu.memory_space<vmem>>, vector<2x16x8x8xf32>
    %1 = vector.extract_strided_slice %0 {offsets = [0, 0, 0, 0], sizes = [1, 16, 8, 8], strides = [1, 1, 1, 1]} : vector<2x16x8x8xf32> to vector<1x16x8x8xf32>
    %2 = vector.shape_cast %1 : vector<1x16x8x8xf32> to vector<16x8x8xf32>
    %3 = vector.extract_strided_slice %0 {offsets = [1, 0, 0, 0], sizes = [1, 16, 8, 8], strides = [1, 1, 1, 1]} : vector<2x16x8x8xf32> to vector<1x16x8x8xf32>
    %4 = vector.shape_cast %3 : vector<1x16x8x8xf32> to vector<16x8x8xf32>
    %5 = arith.maximumf %2, %4 : vector<16x8x8xf32>
    %6 = vector.shape_cast %5 : vector<16x8x8xf32> to vector<8x2x8x8xf32>
    %7 = vector.extract_strided_slice %6 {offsets = [0, 0, 0, 0], sizes = [8, 1, 8, 8], strides = [1, 1, 1, 1]} : vector<8x2x8x8xf32> to vector<8x1x8x8xf32>
    %8 = vector.shape_cast %7 : vector<8x1x8x8xf32> to vector<8x8x8xf32>
    %9 = vector.extract_strided_slice %6 {offsets = [0, 1, 0, 0], sizes = [8, 1, 8, 8], strides = [1, 1, 1, 1]} : vector<8x2x8x8xf32> to vector<8x1x8x8xf32>
    %10 = vector.shape_cast %9 : vector<8x1x8x8xf32> to vector<8x8x8xf32>
    %11 = arith.maximumf %8, %10 : vector<8x8x8xf32>
    %12 = vector.extract_strided_slice %11 {offsets = [0, 0, 0], sizes = [8, 8, 4], strides = [1, 1, 1]} : vector<8x8x8xf32> to vector<8x8x4xf32>
    %13 = vector.extract_strided_slice %11 {offsets = [0, 0, 4], sizes = [8, 8, 4], strides = [1, 1, 1]} : vector<8x8x8xf32> to vector<8x8x4xf32>
    %14 = arith.maximumf %12, %13 : vector<8x8x4xf32>
    %15 = vector.shape_cast %14 : vector<8x8x4xf32> to vector<1x8x8x4xf32>
    %c0_3 = arith.constant 0 : index
    %c0_4 = arith.constant 0 : index
    %c0_5 = arith.constant 0 : index
    %c0_6 = arith.constant 0 : index
    %16 = vector.load %arg3[%c0_3, %c0_4, %c0_5, %c0_6] : memref<1x8x8x4xf32, #tpu.memory_space<vmem>>, vector<1x8x8x4xf32>
    tpu.vector_store %arg3[%c0_3, %c0_4, %c0_5, %c0_6], %15 {strides = array<i32>} : memref<1x8x8x4xf32, #tpu.memory_space<vmem>>, vector<1x8x8x4xf32>,
    return
  }
  func.func @transform_0(%arg0: i32, %arg1: i32) -> (i32, i32, i32, i32) {
    %c0_i32 = arith.constant 0 : i32
    %c0_i32_0 = arith.constant 0 : i32
    %c0_i32_1 = arith.constant 0 : i32
    return %arg0, %arg1, %c0_i32, %c0_i32_0 : i32, i32, i32, i32
  }
  func.func @transform_1(%arg0: i32, %arg1: i32) -> (i32, i32, i32, i32) {
    %c0_i32 = arith.constant 0 : i32
    %c0_i32_0 = arith.constant 0 : i32
    %c0_i32_1 = arith.constant 0 : i32
    return %arg0, %arg1, %c0_i32, %c0_i32_0 : i32, i32, i32, i32
  }
}

</mosaic_0001>

<bundles_post_ra>
// kernel: unet_block_down_forward.1
= control target key start
LH: loop header
LB: loop body
LE: loop exit
PB: predicated region body
PF: predicated region fallthrough
CT: control target
= control target key end

     0   :  { %s427_s6 = smov 0   ;;  %s429_s7 = smov 0   ;;  %s515_s0 = inlined_call_operand.vmem [shape: f32[32,16,8,8], index: 0, kind: input, shape index: {}]   ;;  %s516_s1 = inlined_call_operand.vmem [shape: f32[16,8,8,4], index: 1, kind: output, shape index: {}]  }
   0x1   :  { %s431_s8 = smov 0  }
   0x2 LB: > { %s23_s9 = sadd.s32 1, %s410_s7  ;;  %p357_p0 = scmp.ge.s32.totalorder %s414_s8, 1  ;;  %s414_s8 = sphi %s431_s8, %s11_s8   ;;  %s410_s7 = sphi %s429_s7, %s518_s7   ;;  %s406_s6 = sphi %s427_s6, %s517_s6  }
   0x3   : > { %p25_p1 = scmp.ge.s32.totalorder %s23_s9, 16  ;;  %p110_p2 = scmp.lt.s32.totalorder %s414_s8, 17 }
   0x5   : > { %s520_s9 = smov (%p25_p1, %s23_s9), 0  ;;  %p111_p3 = pnand %p357_p0, %p110_p2 }
   0x6   : > { %s358_s10 = sshll.u32 (!%p111_p3), %s406_s6, 1  ;;  %s416_s15 = smov (!%p111_p3), 124   ;;  %vm257_vm0 = vcmask (!%p111_p3), 31744  }
   0x7   : > { %114 = sbr.rel (%p111_p3) target bundleno = 155 (0x9b), region = 24  ;;  %p141_p4 = scmp.lt.s32.totalorder (!%p111_p3), %s358_s10, 31 }
   0x8   : > { %p152_p5 = scmp.lt.s32.totalorder (!%p111_p3), %s406_s6, 15 }
   0xe   : > { %s522_s10 = smov (!%p141_p4, %s358_s10), 31  ;;  %s524_s6 = smov (!%p152_p5, %s406_s6), 15 }
   0xf   : > { %s365_s11 = sshll.u32 %s522_s10, 7  ;;  %s366_s16 = sshll.u32 %s524_s6, 6 }
  0x10   : > { %s451_s14 = scalar_lea.vmem %s515_s0, %s365_s11  ;;  %s159_s19 = scalar_lea.vmem %s516_s1, %s366_s16 }
  0x11   : > { %v165_v0 = vld [vmem:[%s451_s14 + $0x20] sm:$0xff]  ;;  %v166_v1 = vld [vmem:[%s451_s14 + $0x28] sm:$0xff]  ;;  %v167_v10 = vld [vmem:[%s451_s14 + $0x30] sm:$0xff] }
  0x12   : > { %v181_v2 = vld [vmem:[%s451_s14 + $0xa0] sm:$0xff]  ;;  %v182_v3 = vld [vmem:[%s451_s14 + $0xa8] sm:$0xff]  ;;  %v168_v13 = vld [vmem:[%s451_s14 + $0x38] sm:$0xff] }
  0x13   : > { %v197_v4 = vmax.f32 %v165_v0, %v181_v2  ;;  %v161_v5 = vld [vmem:[%s451_s14] sm:$0xff]  ;;  %v162_v6 = vld [vmem:[%s451_s14 + $0x8] sm:$0xff]  ;;  %v198_v7 = vmax.f32 %v166_v1, %v182_v3  ;;  %v183_v14 = vld [vmem:[%s451_s14 + $0xb0] sm:$0xff] }
  0x14   : > { %v177_v8 = vld [vmem:[%s451_s14 + $0x80] sm:$0xff]  ;;  %v178_v9 = vld [vmem:[%s451_s14 + $0x88] sm:$0xff]  ;;  %v184_v15 = vld [vmem:[%s451_s14 + $0xb8] sm:$0xff]  ;;  %v199_v17 = vmax.f32 %v167_v10, %v183_v14 }
  0x15   : > { %v193_v11 = vmax.f32 %v161_v5, %v177_v8  ;;  %v194_v12 = vmax.f32 %v162_v6, %v178_v9  ;;  %v211_v16 = vmax.f32 %v197_v4, %v198_v7  ;;  %v200_v18 = vmax.f32 %v168_v13, %v184_v15  ;;  %v163_v19 = vld [vmem:[%s451_s14 + $0x10] sm:$0xff]  ;;  %v164_v20 = vld [vmem:[%s451_s14 + $0x18] sm:$0xff]  ;;  %v169_v31 = vld [vmem:[%s451_s14 + $0x40] sm:$0xff] }
  0x16   : > { %v179_v21 = vld [vmem:[%s451_s14 + $0x90] sm:$0xff]  ;;  %v180_v23 = vld [vmem:[%s451_s14 + $0x98] sm:$0xff]  ;;  %v170_v34 = vld [vmem:[%s451_s14 + $0x48] sm:$0xff] }
  0x17   : > { %v209_v22 = vmax.f32 %v193_v11, %v194_v12  ;;  %v195_v24 = vmax.f32 %v163_v19, %v179_v21  ;;  %v171_v25 = vld [vmem:[%s451_s14 + $0x50] sm:$0xff]  ;;  %v172_v26 = vld [vmem:[%s451_s14 + $0x58] sm:$0xff]  ;;  %229 = vrot.lane.b32.xlu1 %v211_v16, %s416_s15  ;;  %v212_v27 = vmax.f32 %v199_v17, %v200_v18  ;;  %v196_v28 = vmax.f32 %v164_v20, %v180_v23  ;;  %v185_v35 = vld [vmem:[%s451_s14 + $0xc0] sm:$0xff] }
  0x18   : > { %v187_v29 = vld [vmem:[%s451_s14 + $0xd0] sm:$0xff]  ;;  %v188_v30 = vld [vmem:[%s451_s14 + $0xd8] sm:$0xff]  ;;  %v186_v36 = vld [vmem:[%s451_s14 + $0xc8] sm:$0xff]  ;;  %v201_v38 = vmax.f32 %v169_v31, %v185_v35 }
  0x19   : > { %225 = vrot.lane.b32.xlu0 %v209_v22, %s416_s15  ;;  %v203_v32 = vmax.f32 %v171_v25, %v187_v29  ;;  %v204_v33 = vmax.f32 %v172_v26, %v188_v30  ;;  %v210_v37 = vmax.f32 %v195_v24, %v196_v28  ;;  %v202_v39 = vmax.f32 %v170_v34, %v186_v36  ;;  %v175_v40 = vld [vmem:[%s451_s14 + $0x70] sm:$0xff]  ;;  %v176_v41 = vld [vmem:[%s451_s14 + $0x78] sm:$0xff]  ;;  %v173_v44 = vld [vmem:[%s451_s14 + $0x60] sm:$0xff] }
  0x1a   : > { %v191_v42 = vld [vmem:[%s451_s14 + $0xf0] sm:$0xff]  ;;  %v192_v43 = vld [vmem:[%s451_s14 + $0xf8] sm:$0xff]  ;;  %v174_v45 = vld [vmem:[%s451_s14 + $0x68] sm:$0xff] }
  0x1b   : > { %231 = vrot.lane.b32.xlu1 %v212_v27, %s416_s15  ;;  %v214_v46 = vmax.f32 %v203_v32, %v204_v33  ;;  %v207_v47 = vmax.f32 %v175_v40, %v191_v42  ;;  %v208_v48 = vmax.f32 %v176_v41, %v192_v43  ;;  %v189_v49 = vld [vmem:[%s451_s14 + $0xe0] sm:$0xff]  ;;  %v190_v50 = vld [vmem:[%s451_s14 + $0xe8] sm:$0xff]  ;;  %v213_v51 = vmax.f32 %v201_v38, %v202_v39 }
  0x1c   : > { %v205_v52 = vmax.f32 %v173_v44, %v189_v49  ;;  %v206_v53 = vmax.f32 %v174_v45, %v190_v50 }
  0x1d   : > { %227 = vrot.lane.b32.xlu0 %v210_v37, %s416_s15  ;;  %v216_v54 = vmax.f32 %v207_v47, %v208_v48 }
  0x1e   : > { %v215_v55 = vmax.f32 %v205_v52, %v206_v53 }
  0x1f   : > { %235 = vrot.lane.b32.xlu1 %v214_v46, %s416_s15 }
  0x21   : > { %233 = vrot.lane.b32.xlu0 %v213_v51, %s416_s15 }
  0x23   : > { %239 = vrot.lane.b32.xlu1 %v216_v54, %s416_s15 }
  0x25   : > { %237 = vrot.lane.b32.xlu0 %v215_v55, %s416_s15 }
  0x89   : > { %v230_v56 = vpop.permute.xlu1 %229 }
  0x8a   : > { %v251_v57 = vmax.f32 %v211_v16, %v230_v56 }
  0x8b   : > { %v226_v58 = vpop.permute.xlu0 %225 }
  0x8c   : > { %v249_v59 = vmax.f32 %v209_v22, %v226_v58  ;;  %260 = vst.msk [vmem:[%s159_s19 + $0x10] sm:$0xff] %vm257_vm0, %v251_v57 }
  0x8d   : > { %v232_v60 = vpop.permute.xlu1 %231 }
  0x8e   : > { %258 = vst.msk [vmem:[%s159_s19] sm:$0xff] %vm257_vm0, %v249_v59  ;;  %v252_v61 = vmax.f32 %v212_v27, %v232_v60 }
  0x8f   : > { %v228_v62 = vpop.permute.xlu0 %227 }
  0x90   : > { %v250_v63 = vmax.f32 %v210_v37, %v228_v62  ;;  %261 = vst.msk [vmem:[%s159_s19 + $0x18] sm:$0xff] %vm257_vm0, %v252_v61 }
  0x91   : > { %v236_v0 = vpop.permute.xlu1 %235 }
  0x92   : > { %259 = vst.msk [vmem:[%s159_s19 + $0x8] sm:$0xff] %vm257_vm0, %v250_v63  ;;  %v254_v1 = vmax.f32 %v214_v46, %v236_v0 }
  0x93   : > { %v234_v2 = vpop.permute.xlu0 %233 }
  0x94   : > { %v253_v3 = vmax.f32 %v213_v51, %v234_v2  ;;  %263 = vst.msk [vmem:[%s159_s19 + $0x28] sm:$0xff] %vm257_vm0, %v254_v1 }
  0x95   : > { %v240_v4 = vpop.permute.xlu1 %239 }
  0x96   : > { %262 = vst.msk [vmem:[%s159_s19 + $0x20] sm:$0xff] %vm257_vm0, %v253_v3  ;;  %v256_v5 = vmax.f32 %v216_v54, %v240_v4 }
  0x97   : > { %v238_v6 = vpop.permute.xlu0 %237 }
  0x98   : > { %v255_v7 = vmax.f32 %v215_v55, %v238_v6  ;;  %265 = vst.msk [vmem:[%s159_s19 + $0x38] sm:$0xff] %vm257_vm0, %v256_v5 }
  0x9a   : > { %264 = vst.msk [vmem:[%s159_s19 + $0x30] sm:$0xff] %vm257_vm0, %v255_v7 }
  0x9b PF: > { %s11_s8 = sadd.s32 1, %s414_s8   ;;  %s517_s6 = smov %s410_s7 }
  0x9c   : > { %p8_p6 = scmp.ge.s32.totalorder %s11_s8, 18   ;;  %s518_s7 = smov %s520_s9 }
  0x9e   :  { %10 = sbr.rel (!%p8_p6) target bundleno = 2 (0x2), region = 54 }

</bundles_post_ra>
